<compile_context>
chip_gen: v6e
topology: v6e:2x2x1
jax: 0.10.0
libtpu: 0.0.40
codegen_flags: <defaults>
</compile_context>

<pallas_src>
import jax
import jax.numpy as jnp
from jax.experimental import pallas as pl
from jax.experimental.pallas import tpu as pltpu


def _make_kernel(hw_real, thw, needs_mask):
    """Builds the kernel with compile-time constants closed over."""
    inv_hw = 1.0 / float(hw_real)

    def kernel(x_ref, w1t_ref, w2t_ref, o_ref, max_acc, sum_acc):
        # x_ref:   (TN, C, THW)   input tile (native dtype)
        # w1t_ref: (C, Cr)        transposed conv1 weight (resident)
        # w2t_ref: (Cr, C)        transposed conv2 weight (resident)
        # o_ref:   (TN, C)        output block (resident across k)
        # max_acc/sum_acc: (TN, C) f32 running-pool accumulators
        k = pl.program_id(1)
        nk = pl.num_programs(1)

        @pl.when(k == 0)
        def _init():
            max_acc[...] = jnp.full_like(max_acc, -jnp.inf)
            sum_acc[...] = jnp.zeros_like(sum_acc)

        x = x_ref[...].astype(jnp.float32)                    # (TN, C, THW)

        if needs_mask:
            # Mask zero-padded lanes out of the max (they already contribute
            # 0 to the sum, which is divided by the true HW).
            lane = jax.lax.broadcasted_iota(jnp.int32, x.shape, dimension=2)
            valid = (k * thw + lane) < hw_real
            x_max = jnp.where(valid, x, -jnp.inf)
        else:
            x_max = x

        max_acc[...] = jnp.maximum(max_acc[...], jnp.max(x_max, axis=-1))
        sum_acc[...] = sum_acc[...] + jnp.sum(x, axis=-1)

        @pl.when(k == nk - 1)
        def _finalize():
            mx = max_acc[...]                                  # (TN, C)
            av = sum_acc[...] * inv_hw                         # (TN, C)
            # Fused squeeze-excite MLP on both pooled vectors at once.
            pooled = jnp.concatenate([mx, av], axis=0)         # (2*TN, C)
            h = jnp.dot(pooled, w1t_ref[...],
                        preferred_element_type=jnp.float32)    # (2*TN, Cr)
            h = jnp.maximum(h, 0.0)
            y = jnp.dot(h, w2t_ref[...],
                        preferred_element_type=jnp.float32)    # (2*TN, C)
            tn = mx.shape[0]
            o_ref[...] = jax.nn.sigmoid(y[:tn] + y[tn:]).astype(o_ref.dtype)

    return kernel


def channel_attention_module(inputs, w1, w2, *, thw_cap=2048,
                             input_tile_budget_bytes=8 << 20):
    """inputs: (N, C, H, W) float32/bfloat16 (NCHW, as in PyTorch).
    w1: (C//r, C)  conv1x1 weight (out, in), bias=False
    w2: (C, C//r)  conv1x1 weight (out, in), bias=False
    Returns (N, C, 1, 1) float32, matching the PyTorch module."""
    N, C, H, W = inputs.shape
    HW = H * W
    Cr = w1.shape[0]

    x3 = inputs.reshape(N, C, HW)          # keep native dtype (bf16 OK)
    itemsize = x3.dtype.itemsize

    # Batch tile: full N for small batches; blocks of 8 (sublane-aligned) for
    # large multiples of 8, giving a real "parallel" axis for v7x's 2 TCs.
    TN = 8 if (N > 8 and N % 8 == 0) else N
    num_nb = N // TN

    # Spatial tile: multiple of 128 lanes, sized so the two double-buffered
    # input tiles stay within a comfortable VMEM budget (works on v7x's
    # smaller VMEM too).
    max_thw = (input_tile_budget_bytes // (2 * TN * C * itemsize)) // 128 * 128
    thw = int(min(thw_cap, max(128, max_thw), int(pl.cdiv(HW, 128)) * 128))
    thw = max(128, (thw // 128) * 128)

    hw_pad = int(pl.cdiv(HW, thw)) * thw
    needs_mask = hw_pad != HW
    if needs_mask:
        x3 = jnp.pad(x3, ((0, 0), (0, 0), (0, hw_pad - HW)))
    num_k = hw_pad // thw

    w1t = jnp.transpose(w1).astype(jnp.float32)   # (C, Cr)
    w2t = jnp.transpose(w2).astype(jnp.float32)   # (Cr, C)

    kernel = _make_kernel(HW, thw, needs_mask)

    # Explicit VMEM budget: double-buffered input tile + weights + output +
    # accumulators + headroom.
    vmem_bytes = (2 * TN * C * thw * itemsize
                  + 2 * (C * Cr + Cr * C) * 4
                  + 2 * TN * C * 4
                  + 2 * TN * C * 4
                  + (4 << 20))
    vmem_bytes = int(min(vmem_bytes, 48 << 20))

    out = pl.pallas_call(
        kernel,
        out_shape=jax.ShapeDtypeStruct((N, C), jnp.float32),
        grid_spec=pltpu.PrefetchScalarGridSpec(
            num_scalar_prefetch=0,
            grid=(num_nb, num_k),
            in_specs=[
                pl.BlockSpec((TN, C, thw), lambda i, k: (i, 0, k)),
                pl.BlockSpec((C, Cr), lambda i, k: (0, 0)),   # resident weights
                pl.BlockSpec((Cr, C), lambda i, k: (0, 0)),   # resident weights
            ],
            out_specs=pl.BlockSpec((TN, C), lambda i, k: (i, 0)),
            scratch_shapes=[
                pltpu.VMEM((TN, C), jnp.float32),   # running max
                pltpu.VMEM((TN, C), jnp.float32),   # running sum
            ],
        ),
        compiler_params=pltpu.CompilerParams(
            dimension_semantics=("parallel", "arbitrary"),
            vmem_limit_bytes=vmem_bytes,
        ),
    )(x3, w1t, w2t)

    return out.reshape(N, C, 1, 1)


def _reference(inputs, w1, w2):
    # Plain-JAX reference of the PyTorch forward for verification.
    xf = inputs.astype(jnp.float32)
    max_p = jnp.max(xf, axis=(2, 3))    # (N, C)
    avg_p = jnp.mean(xf, axis=(2, 3))   # (N, C)

    def fc(v):
        h = jnp.maximum(v @ w1.T, 0.0)
        return h @ w2.T

    return jax.nn.sigmoid(fc(max_p) + fc(avg_p)).reshape(
        inputs.shape[0], inputs.shape[1], 1, 1)


if __name__ == "__main__":
    # Small shapes consistent with the module: in_channel=4, reduction=2.
    N, C, H, W = 2, 4, 16, 16
    reduction = 2
    Cr = C // reduction

    key = jax.random.PRNGKey(0)
    kx, k1, k2, kn = jax.random.split(key, 4)

    x = jax.random.normal(kx, (N, C, H, W), dtype=jnp.float32)
    # Deterministic synthetic conv1x1 weights (out_channels, in_channels).
    w1 = jax.random.normal(k1, (Cr, C), dtype=jnp.float32) * 0.1
    w2 = jax.random.normal(k2, (C, Cr), dtype=jnp.float32) * 0.1

    # Main run (single spatial tile).
    out = channel_attention_module(x, w1, w2)
    out = jax.block_until_ready(out)
    ref = _reference(x, w1, w2)
    assert out.shape == (N, C, 1, 1)
    assert jnp.allclose(out, ref, atol=1e-5, rtol=1e-5), (
        f"max abs err {jnp.max(jnp.abs(out - ref))}")

    # Multi-tile reduction path (forces 2 spatial tiles via a small cap).
    out_tiled = jax.block_until_ready(
        channel_attention_module(x, w1, w2, thw_cap=128))
    assert jnp.allclose(out_tiled, ref, atol=1e-5, rtol=1e-5), (
        f"tiled max abs err {jnp.max(jnp.abs(out_tiled - ref))}")

    # Ragged-HW + all-negative inputs to exercise the -inf masking of the
    # zero-padded lanes in the max accumulator.
    xr = -jnp.abs(jax.random.normal(kn, (N, C, 5, 7), dtype=jnp.float32)) - 0.1
    out_r = jax.block_until_ready(channel_attention_module(xr, w1, w2))
    ref_r = _reference(xr, w1, w2)
    assert jnp.allclose(out_r, ref_r, atol=1e-5, rtol=1e-5), (
        f"ragged max abs err {jnp.max(jnp.abs(out_r - ref_r))}")

    print("KERNEL_OK")
</pallas_src>

<mosaic_0001>
module attributes {stable_mosaic.version = 11 : i64} {
  func.func @kernel(%arg0: i32, %arg1: i32, %arg2: memref<2x4x256xf32, #tpu.memory_space<vmem>>, %arg3: memref<4x2xf32, #tpu.memory_space<vmem>>, %arg4: memref<2x4xf32, #tpu.memory_space<vmem>>, %arg5: memref<2x4xf32, #tpu.memory_space<vmem>>, %arg6: memref<2x4xf32, #tpu.memory_space<vmem>>, %arg7: memref<2x4xf32, #tpu.memory_space<vmem>>) attributes {dimension_semantics = [#tpu.dimension_semantics<parallel>, #tpu.dimension_semantics<arbitrary>], iteration_bounds = array<i64: 1, 1>, scalar_prefetch = 0 : i64, scratch_operands = 2 : i64, tpu.core_type = #tpu.core_type<tc>, window_params = [{transform_indices = @transform_0, window_bounds = array<i64: 2, 4, 256>}, {pipeline_mode = #tpu.pipeline_mode<synchronous>, transform_indices = @transform_1, window_bounds = array<i64: 4, 2>}, {pipeline_mode = #tpu.pipeline_mode<synchronous>, transform_indices = @transform_2, window_bounds = array<i64: 2, 4>}, {transform_indices = @transform_3, window_bounds = array<i64: 2, 4>}]} {
    %c0_i32 = arith.constant 0 : i32
    %0 = arith.cmpi eq, %arg1, %c0_i32 : i32
    %1 = arith.extui %0 : i1 to i32
    %c0_i32_0 = arith.constant 0 : i32
    %2 = arith.cmpi ne, %1, %c0_i32_0 : i32
    scf.if %2 {
      %cst_14 = arith.constant 0xFF800000 : f32
      %15 = vector.broadcast %cst_14 : f32 to vector<2x4xf32>
      %c0_15 = arith.constant 0 : index
      %c0_16 = arith.constant 0 : index
      %16 = vector.load %arg6[%c0_15, %c0_16] : memref<2x4xf32, #tpu.memory_space<vmem>>, vector<2x4xf32>
      tpu.vector_store %arg6[%c0_15, %c0_16], %15 {strides = array<i32>} : memref<2x4xf32, #tpu.memory_space<vmem>>, vector<2x4xf32>,
      %cst_17 = arith.constant 0.000000e+00 : f32
      %17 = vector.broadcast %cst_17 : f32 to vector<2x4xf32>
      %c0_18 = arith.constant 0 : index
      %c0_19 = arith.constant 0 : index
      %18 = vector.load %arg7[%c0_18, %c0_19] : memref<2x4xf32, #tpu.memory_space<vmem>>, vector<2x4xf32>
      tpu.vector_store %arg7[%c0_18, %c0_19], %17 {strides = array<i32>} : memref<2x4xf32, #tpu.memory_space<vmem>>, vector<2x4xf32>,
    } else {
    }
    %c0 = arith.constant 0 : index
    %c0_1 = arith.constant 0 : index
    %c0_2 = arith.constant 0 : index
    %3 = vector.load %arg2[%c0, %c0_1, %c0_2] : memref<2x4x256xf32, #tpu.memory_space<vmem>>, vector<2x4x256xf32>
    %c0_3 = arith.constant 0 : index
    %c0_4 = arith.constant 0 : index
    %4 = vector.load %arg6[%c0_3, %c0_4] : memref<2x4xf32, #tpu.memory_space<vmem>>, vector<2x4xf32>
    %cst = arith.constant dense<0xFF800000> : vector<2x4xf32>
    %5 = vector.multi_reduction <maximumf>, %3, %cst [2] : vector<2x4x256xf32> to vector<2x4xf32>
    %6 = arith.maximumf %4, %5 : vector<2x4xf32>
    %c0_5 = arith.constant 0 : index
    %c0_6 = arith.constant 0 : index
    %7 = vector.load %arg6[%c0_5, %c0_6] : memref<2x4xf32, #tpu.memory_space<vmem>>, vector<2x4xf32>
    tpu.vector_store %arg6[%c0_5, %c0_6], %6 {strides = array<i32>} : memref<2x4xf32, #tpu.memory_space<vmem>>, vector<2x4xf32>,
    %c0_7 = arith.constant 0 : index
    %c0_8 = arith.constant 0 : index
    %8 = vector.load %arg7[%c0_7, %c0_8] : memref<2x4xf32, #tpu.memory_space<vmem>>, vector<2x4xf32>
    %cst_9 = arith.constant dense<0.000000e+00> : vector<2x4xf32>
    %9 = vector.multi_reduction <add>, %3, %cst_9 [2] : vector<2x4x256xf32> to vector<2x4xf32>
    %10 = arith.addf %8, %9 : vector<2x4xf32>
    %c0_10 = arith.constant 0 : index
    %c0_11 = arith.constant 0 : index
    %11 = vector.load %arg7[%c0_10, %c0_11] : memref<2x4xf32, #tpu.memory_space<vmem>>, vector<2x4xf32>
    tpu.vector_store %arg7[%c0_10, %c0_11], %10 {strides = array<i32>} : memref<2x4xf32, #tpu.memory_space<vmem>>, vector<2x4xf32>,
    %c0_i32_12 = arith.constant 0 : i32
    %12 = arith.cmpi eq, %arg1, %c0_i32_12 : i32
    %13 = arith.extui %12 : i1 to i32
    %c0_i32_13 = arith.constant 0 : i32
    %14 = arith.cmpi ne, %13, %c0_i32_13 : i32
    scf.if %14 {
      %c0_14 = arith.constant 0 : index
      %c0_15 = arith.constant 0 : index
      %15 = vector.load %arg6[%c0_14, %c0_15] : memref<2x4xf32, #tpu.memory_space<vmem>>, vector<2x4xf32>
      %c0_16 = arith.constant 0 : index
      %c0_17 = arith.constant 0 : index
      %16 = vector.load %arg7[%c0_16, %c0_17] : memref<2x4xf32, #tpu.memory_space<vmem>>, vector<2x4xf32>
      %cst_18 = arith.constant 3.906250e-03 : f32
      %17 = vector.broadcast %cst_18 : f32 to vector<2x4xf32>
      %18 = arith.mulf %16, %17 : vector<2x4xf32>
      %19 = tpu.concatenate %15, %18 in 0 : vector<2x4xf32>, vector<2x4xf32> -> vector<4x4xf32>
      %c0_19 = arith.constant 0 : index
      %c0_20 = arith.constant 0 : index
      %20 = vector.load %arg3[%c0_19, %c0_20] : memref<4x2xf32, #tpu.memory_space<vmem>>, vector<4x2xf32>
      %cst_21 = arith.constant dense<0.000000e+00> : vector<4x2xf32>
      %21 = tpu.matmul %19, %20, %cst_21 {dimension_numbers = #tpu.dot_dimension_numbers<[1], [0], [0], [1], [0, 0, 1, 1], [], []>} : vector<4x4xf32>, vector<4x2xf32>, vector<4x2xf32> -> vector<4x2xf32>
      %cst_22 = arith.constant 0.000000e+00 : f32
      %22 = vector.broadcast %cst_22 : f32 to vector<4x2xf32>
      %23 = arith.maximumf %21, %22 : vector<4x2xf32>
      %c0_23 = arith.constant 0 : index
      %c0_24 = arith.constant 0 : index
      %24 = vector.load %arg4[%c0_23, %c0_24] : memref<2x4xf32, #tpu.memory_space<vmem>>, vector<2x4xf32>
      %cst_25 = arith.constant dense<0.000000e+00> : vector<4x4xf32>
      %25 = tpu.matmul %23, %24, %cst_25 {dimension_numbers = #tpu.dot_dimension_numbers<[1], [0], [0], [1], [0, 0, 1, 1], [], []>} : vector<4x2xf32>, vector<2x4xf32>, vector<4x4xf32> -> vector<4x4xf32>
      %26 = vector.extract_strided_slice %25 {offsets = [0, 0], sizes = [2, 4], strides = [1, 1]} : vector<4x4xf32> to vector<2x4xf32>
      %27 = vector.extract_strided_slice %25 {offsets = [2, 0], sizes = [2, 4], strides = [1, 1]} : vector<4x4xf32> to vector<2x4xf32>
      %28 = arith.addf %26, %27 : vector<2x4xf32>
      %29 = arith.negf %28 : vector<2x4xf32>
      %30 = math.exp %29 : vector<2x4xf32>
      %cst_26 = arith.constant 1.000000e+00 : f32
      %31 = vector.broadcast %cst_26 : f32 to vector<2x4xf32>
      %32 = arith.addf %31, %30 : vector<2x4xf32>
      %33 = arith.divf %31, %32 : vector<2x4xf32>
      %c0_27 = arith.constant 0 : index
      %c0_28 = arith.constant 0 : index
      %34 = vector.load %arg5[%c0_27, %c0_28] : memref<2x4xf32, #tpu.memory_space<vmem>>, vector<2x4xf32>
      tpu.vector_store %arg5[%c0_27, %c0_28], %33 {strides = array<i32>} : memref<2x4xf32, #tpu.memory_space<vmem>>, vector<2x4xf32>,
    } else {
    }
    return
  }
  func.func @transform_0(%arg0: i32, %arg1: i32) -> (i32, i32, i32) {
    %c0_i32 = arith.constant 0 : i32
    %c0_i32_0 = arith.constant 0 : i32
    return %arg0, %c0_i32, %arg1 : i32, i32, i32
  }
  func.func @transform_1(%arg0: i32, %arg1: i32) -> (i32, i32) {
    %c0_i32 = arith.constant 0 : i32
    %c0_i32_0 = arith.constant 0 : i32
    %c0_i32_1 = arith.constant 0 : i32
    return %c0_i32, %c0_i32_0 : i32, i32
  }
  func.func @transform_2(%arg0: i32, %arg1: i32) -> (i32, i32) {
    %c0_i32 = arith.constant 0 : i32
    %c0_i32_0 = arith.constant 0 : i32
    %c0_i32_1 = arith.constant 0 : i32
    return %c0_i32, %c0_i32_0 : i32, i32
  }
  func.func @transform_3(%arg0: i32, %arg1: i32) -> (i32, i32) {
    %c0_i32 = arith.constant 0 : i32
    %c0_i32_0 = arith.constant 0 : i32
    return %arg0, %c0_i32 : i32, i32
  }
}

</mosaic_0001>

<bundles_post_ra>
// kernel: tpu_custom_call.1
= control target key start
LH: loop header
LB: loop body
LE: loop exit
PB: predicated region body
PF: predicated region fallthrough
CT: control target
= control target key end

     0   :  { %8 = vsyncpa [#allocation5], 0  ;;  %s422_s0 = inlined_call_operand.hbm [shape: f32[2,4,256], index: 0, kind: input, shape index: {}]   ;;  %s423_s1 = inlined_call_operand.vmem [shape: f32[4,2], index: 1, kind: input, shape index: {}]   ;;  %s424_s2 = inlined_call_operand.vmem [shape: f32[2,4], index: 2, kind: input, shape index: {}]   ;;  %s425_s3 = inlined_call_operand.hbm [shape: f32[2,4], index: 3, kind: output, shape index: {}]  }
   0x1   :  { %9 = vsyncpa [#allocation6], 0  ;;  %s369_s12 = smov [#allocation4]  }
   0x2   :  { %s15_s13 = sshll.u32 %s369_s12, 4  ;;  %s16_s13 = int_to_ptr.vmem [resolvable:$true] %s15_s13 }
   0x3   :  { %s333_s14 = scalar_lea.vmem %s16_s13, 256  ;;  %p338_p1 = scmp.lt.s32.totalorder %s16_s13, %s16_s13 }
   0x4   :  { %p334_p0 = scmp.ne.s32.totalorder %s16_s13, %s333_s14  ;;  %p339_p2 = scmp.lt.s32.totalorder %s333_s14, %s333_s14 }
   0x6   :  { %p340_p3 = por %p339_p2, %p338_p1 }
   0x8   :  { %p341_p4 = pnand %p340_p3, %p334_p0 }
   0xa   :  { %344 = shalt.err (!%p341_p4)
}
   0xb   :  { %s370_s15 = smov 128   ;;  %s371_s16 = smov 8  }
   0xc   :  { %21 = dma.hbm_to_vmem [thread:$0]  %s422_s0, 256, %s16_s13, [#allocation5], %s370_s15, %s370_s15, %s371_s16  }
   0xd   :  { %365 = dma.done.wait [#allocation5], 256  }
   0xe   :  { %366 = vsyncadd [#allocation5], 4294967040  ;;  %vm45_vm0 = vcmask 1043456   ;;  %v36_v0 = vld [vmem:[#allocation4] sm:$0xff]  ;;  %v37_v1 = vld [vmem:[#allocation4 + $0x8] sm:$0xff]  ;;  %vm33_vm1 = vcmask 25600   ;;  %v58_v19 = vlaneseq }
   0xf   :  { %v41_v2 = vcombine.high %v36_v0, %v36_v0  ;;  %v75_v3 = vsel %vm45_vm0, %v36_v0, 0.0  ;;  %v46_v4 = vsel %vm45_vm0, %v36_v0, -inf  ;;  %v42_v5 = vcombine.high %v37_v1, %v37_v1  ;;  %v110_v18 = vld [vmem:[%s423_s1] sm:$0xf]  ;;  %s375_s21 = smov [#allocation7]  }
  0x10   :  { %v80_v6 = vsel %vm45_vm0, %v37_v1, 0.0  ;;  %v51_v7 = vsel %vm45_vm0, %v37_v1, -inf  ;;  %v372_v16 = vmov -inf   ;;  %v373_v17 = vmov 0.0   ;;  %v189_v42 = vld [vmem:[%s424_s2] sm:$0x3] }
  0x11   :  { %v76_v8 = vsel %vm45_vm0, %v41_v2, 0.0  ;;  %v47_v9 = vsel %vm45_vm0, %v41_v2, -inf  ;;  %v81_v10 = vsel %vm45_vm0, %v42_v5, 0.0  ;;  %v52_v11 = vsel %vm45_vm0, %v42_v5, -inf  ;;  %34 = vst.msk [vmem:[#allocation2] sm:$0x3] %vm33_vm1, %v372_v16  ;;  %302 = vmatprep.subr.mxu0 %v373_v17  ;;  %307 = vmatprep.subr.mxu1 %v373_v17 }
  0x12   :  { %v77_v12 = vadd.f32 %v76_v8, %v75_v3  ;;  %v48_v13 = vmax.f32 %v46_v4, %v47_v9  ;;  %v82_v14 = vadd.f32 %v81_v10, %v80_v6  ;;  %v53_v15 = vmax.f32 %v51_v7, %v52_v11  ;;  %35 = vst.msk [vmem:[#allocation3] sm:$0x3] %vm33_vm1, %v373_v17  ;;  %s284_s22 = sshll.u32 %s375_s21, 4  ;;  %s285_s22 = int_to_ptr.vmem [resolvable:$true] %s284_s22 }
  0x13   :  { %303 = vmatpush3.msk.msra.mxu0 %vm45_vm0, %v110_v18  ;;  %vm374_vm2 = vmmov 0   ;;  %v59_v20 = vand.u32 127, %v58_v19  ;;  %v61_v21 = vshrl.u32 %v58_v19, 7  ;;  %vm68_vm3 = vcmask 1041409   ;;  %s345_s2 = scalar_lea.vmem %s285_s22, 32  ;;  %p350_p6 = scmp.lt.s32.totalorder %s285_s22, %s285_s22 }
  0x14   :  { %78 = vadd.xlane.f32.xlu0 %v77_v12  ;;  %49 = vmax.xlane.f32.xlu1 %v48_v13  ;;  %vm108_vm4 = vcmask 1041408   ;;  %vm111_vm5 = vcmask 31744   ;;  %vm190_vm6 = vcmask 15360   ;;  %p346_p5 = scmp.ne.s32.totalorder %s285_s22, %s345_s2  ;;  %p351_p7 = scmp.lt.s32.totalorder %s345_s2, %s345_s2 }
  0x15   :  { %304 = vmatprep.mubr.msk.f32.mxu0 %vm374_vm2, %v373_v17  ;;  %309 = vmatprep.mubr.msk.f32.mxu1 %vm374_vm2, %v373_v17  ;;  %v62_v24 = vsub.s32 %v59_v20, %v61_v21 }
  0x16   :  { %308 = vmatpush3.msk.msra.mxu1 %vm108_vm4, %v189_v42  ;;  %p352_p8 = por %p351_p7, %p350_p6 }
  0x18   :  { %83 = vadd.xlane.f32.xlu0 %v82_v14  ;;  %54 = vmax.xlane.f32.xlu1 %v53_v15  ;;  %v38_v30 = vld [vmem:[#allocation2] sm:$0x3]  ;;  %p353_p9 = pnand %p352_p8, %p346_p5 }
  0x19   :  { %v74_v32 = vld [vmem:[#allocation3] sm:$0x3] }
  0x9d   :  { %v79_v22 = vpop.xlane.xlu0 %78  ;;  %v50_v23 = vpop.xlane.xlu1 %49 }
  0x9e   :  { %v63_v25 = vrot.slane %v50_v23, %v62_v24  ;;  %v90_v28 = vrot.slane %v79_v22, %v62_v24 }
  0xa1   :  { %v84_v26 = vpop.xlane.xlu0 %83  ;;  %v55_v27 = vpop.xlane.xlu1 %54 }
  0xa2   :  { %v94_v29 = vrot.slane %v84_v26, %v62_v24  ;;  %v67_v31 = vrot.slane %v55_v27, %v62_v24 }
  0xa4   :  { %v95_v33 = vsel %vm68_vm3, %v94_v29, %v90_v28  ;;  %v69_v34 = vsel %vm68_vm3, %v67_v31, %v63_v25 }
  0xa5   :  { %v71_v35 = vmax.f32 %v38_v30, %v69_v34  ;;  %v97_v36 = vadd.f32 %v95_v33, %v74_v32 }
  0xa7   :  { %73 = vst.msk [vmem:[#allocation2] sm:$0x3] %vm33_vm1, %v71_v35  ;;  %98 = vst.msk [vmem:[#allocation3] sm:$0x3] %vm33_vm1, %v97_v36 }
  0xae   :  { %v103_v37 = vld [vmem:[#allocation3] sm:$0x3]  ;;  %v102_v40 = vld [vmem:[#allocation2] sm:$0x3] }
  0xaf   :  { %v104_v38 = vmul.f32 0.00390625, %v103_v37 }
  0xb1   :  { %v106_v39 = vrot.slane %v104_v38, 6 }
  0xb3   :  { %v109_v41 = vsel %vm108_vm4, %v102_v40, %v106_v39 }
  0xb4   :  { %305 = vmatmul.mubr.msk.f32.vlgmr.msra.gmra.mxu0 %vm111_vm5, %v109_v41 }
 0x174   :  { %v184_v43 = vpop.f32.mrf.mxu0 }
 0x175   :  { %v188_v44 = vmax.f32 %v184_v43, 0.0 }
 0x176   :  { %v306_v45 = vpop.f32.mrf.mxu0 }
 0x177   :  { %310 = vmatmul.mubr.msk.f32.vlgmr.msra.gmra.mxu1 %vm190_vm6, %v188_v44 }
 0x237   :  { %v263_v46 = vpop.f32.mrf.mxu1 }
 0x238   :  { %v268_v47 = vrot.slane %v263_v46, 2 }
 0x239   :  { %v311_v48 = vpop.f32.mrf.mxu1 }
 0x23a   :  { %v270_v49 = vadd.f32 %v268_v47, %v263_v46 }
 0x23c   :  { %v297_v50 = vmul.f32 -1.442695, %v270_v49 }
 0x23e   :  { %321 = vpow2.f32 %v297_v50 }
 0x24b   :  { %v322_v51 = vpop.eup %321 }
 0x24c   :  { %v274_v52 = vadd.f32 1.0, %v322_v51 }
 0x24e   :  { %323 = vrcp.f32 %v274_v52 }
 0x25b   :  { %v324_v53 = vpop.eup %323 }
 0x25c   :  { %277 = vst.msk [vmem:[#allocation7] sm:$0x3] %vm33_vm1, %v324_v53 }
 0x25d   :  { %356 = shalt.err (!%p353_p9)
}
 0x25e   :  { %287 = dma.vmem_to_hbm [thread:$0]  %s285_s22, 32, %s425_s3, [#allocation6]  }
 0x25f   :  { %367 = dma.done.wait [#allocation6], 32  }
 0x260   :  { %368 = vsyncadd [#allocation6], 4294967264 }
 0x261   :  { %291 = vsyncpa [#allocation5], 1 }
 0x262   :  { %292 = vsyncpa [#allocation6], 1 }

</bundles_post_ra>
